<compile_context>
chip_gen: v6e
topology: v6e:2x2x1
jax: 0.10.0
libtpu: 0.0.40
codegen_flags: <defaults>
</compile_context>

<pallas_src>
import jax
import jax.numpy as jnp
import numpy as np
from jax.experimental import pallas as pl
from jax.experimental.pallas import tpu as pltpu

RHS_FILL = -1000000.0   # reference fills RHS with -1e6 before scattering Eventually results
EV_INIT = -10000.0      # LARGE_NUMBER: Eventually's RNN initial hidden state


def _recip(x):
    # one EUP vrcp + one Newton step (cheap VPU muls) -> ~f32-accurate reciprocal, no divide.
    r = pl.reciprocal(x, approx=True)
    return r * (2.0 - x * r)


def make_then_kernel(T, dt, scale):
    soft = scale > 0.0

    def kernel(x1_ref, x2_ref, o_ref):
        x2 = x2_ref[0]                                           # [T(s), dt] -- the LHS rows
        s_idx = jax.lax.broadcasted_iota(jnp.int32, (T, dt), 0)  # row index == start time s

        # r[s, d] carries E[t, s, d]; per-t update:
        #   r[t]   = max(EV_INIT, x1[t]);  r[s<t] = max(r[s], x1[t]);  r[s>t] = RHS_FILL
        r = jnp.full((T, dt), RHS_FILL, dtype=jnp.float32)

        # T (time dim) is small/static for STL traces -> fully static unrolled time loop.
        # TODO(synk): for very long traces switch to lax.fori_loop with pl.ds row access.
        for t in range(T):
            x1_t = x1_ref[0, t:t + 1, :]                         # [1, dt]
            r = jnp.where(s_idx == t, EV_INIT, r)
            r = jnp.where(s_idx <= t, jnp.maximum(r, x1_t), RHS_FILL)

            lhs, rhs = x2, r
            hard_min = jnp.minimum(lhs, rhs)
            if soft:
                # pairwise softmin: (mn + w*mx) / (1 + w), w = exp(-|lhs - rhs| * scale)
                hard_max = jnp.maximum(lhs, rhs)
                w = jnp.exp(-jnp.abs(lhs - rhs) * scale)
                inner = (hard_min + w * hard_max) * _recip(1.0 + w)
                # stabilized softmax over s: sum(softmax(inner*scale) * inner)
                mx = jnp.max(inner, axis=0, keepdims=True)       # [1, dt]
                e = jnp.exp((inner - mx) * scale)
                out_t = jnp.sum(e * inner, axis=0, keepdims=True) * _recip(
                    jnp.sum(e, axis=0, keepdims=True))
            else:
                out_t = jnp.max(hard_min, axis=0, keepdims=True)  # [1, dt]
            o_ref[0, t:t + 1, :] = out_t

    return kernel


def then_forward(trace1, trace2, scale=0.0):
    """Pallas port of Then.forward(trace1, trace2, scale). Traces: [B, T, D] float32."""
    assert trace1.shape == trace2.shape
    B, T, D = trace1.shape
    # lane tile: a multiple of 128 that divides D, else fall back to the full extent
    dt = D
    for cand in (512, 256, 128):
        if D % cand == 0:
            dt = cand
            break
    grid = (B, D // dt)
    spec = pl.BlockSpec((1, T, dt), lambda b, j: (b, 0, j))
    return pl.pallas_call(
        make_then_kernel(T, dt, float(scale)),
        grid=grid,
        in_specs=[spec, spec],
        out_specs=spec,
        out_shape=jax.ShapeDtypeStruct((B, T, D), jnp.float32),
        compiler_params=pltpu.CompilerParams(
            dimension_semantics=("parallel", "parallel")),
    )(trace1.astype(jnp.float32), trace2.astype(jnp.float32))


def then_reference(trace1, trace2, scale=0.0):
    """Direct JAX translation of the PyTorch Then.robustness_trace."""
    B, T, D = trace2.shape
    # LHS[b, t, d, s] = trace2[b, s, d]
    LHS = jnp.transpose(jnp.repeat(trace2[..., None], T, axis=-1), (0, 3, 2, 1))
    RHS = jnp.full(LHS.shape, RHS_FILL, dtype=jnp.float32)
    for i in range(T):
        # Eventually(trace1[:, i:, :]) with scale=0: running max with -LARGE_NUMBER init
        ev = jnp.maximum(jax.lax.cummax(trace1[:, i:, :], axis=1), EV_INIT)
        RHS = RHS.at[:, i:, :, i].set(ev)
    stacked = jnp.stack([LHS, RHS], axis=-1)
    if scale > 0:
        inner = jnp.sum(jax.nn.softmax(-stacked * scale, axis=-1) * stacked, axis=-1)
        out = jnp.sum(jax.nn.softmax(inner * scale, axis=-1) * inner, axis=-1)
    else:
        inner = jnp.min(stacked, axis=-1)
        out = jnp.max(inner, axis=-1)
    return out


if __name__ == "__main__":
    key = jax.random.PRNGKey(0)
    B, T, D = 2, 8, 128          # [batch, time, x_dim]
    k1, k2 = jax.random.split(key)
    trace1 = jax.random.normal(k1, (B, T, D), dtype=jnp.float32)
    trace2 = jax.random.normal(k2, (B, T, D), dtype=jnp.float32)

    # Hard path (scale=0) -- the PyTorch default for Then.forward.
    out_hard = then_forward(trace1, trace2, scale=0.0)
    jax.block_until_ready(out_hard)
    ref_hard = then_reference(trace1, trace2, scale=0.0)
    np.testing.assert_allclose(np.asarray(out_hard), np.asarray(ref_hard),
                               rtol=1e-6, atol=1e-6)

    # Soft path (scale > 0).
    out_soft = then_forward(trace1, trace2, scale=2.5)
    jax.block_until_ready(out_soft)
    ref_soft = then_reference(trace1, trace2, scale=2.5)
    np.testing.assert_allclose(np.asarray(out_soft), np.asarray(ref_soft),
                               rtol=1e-4, atol=1e-4)

    print("KERNEL_OK")
</pallas_src>

<mosaic_0001>
module attributes {stable_mosaic.version = 11 : i64} {
  func.func @kernel(%arg0: i32, %arg1: i32, %arg2: memref<1x8x128xf32, #tpu.memory_space<vmem>>, %arg3: memref<1x8x128xf32, #tpu.memory_space<vmem>>, %arg4: memref<1x8x128xf32, #tpu.memory_space<vmem>>) attributes {dimension_semantics = [#tpu.dimension_semantics<parallel>, #tpu.dimension_semantics<parallel>], iteration_bounds = array<i64: 2, 1>, scalar_prefetch = 0 : i64, scratch_operands = 0 : i64, tpu.core_type = #tpu.core_type<tc>, window_params = [{transform_indices = @transform_0, window_bounds = array<i64: 1, 8, 128>}, {transform_indices = @transform_1, window_bounds = array<i64: 1, 8, 128>}, {transform_indices = @transform_2, window_bounds = array<i64: 1, 8, 128>}]} {
    %c0 = arith.constant 0 : index
    %c0_0 = arith.constant 0 : index
    %c0_1 = arith.constant 0 : index
    %0 = vector.load %arg3[%c0, %c0_0, %c0_1] : memref<1x8x128xf32, #tpu.memory_space<vmem>>, vector<1x8x128xf32>
    %1 = vector.shape_cast %0 : vector<1x8x128xf32> to vector<8x128xf32>
    %2 = tpu.iota {dimensions = array<i32: 0>} : vector<8x128xi32>
    %cst = arith.constant -1.000000e+06 : f32
    %3 = vector.broadcast %cst : f32 to vector<8x128xf32>
    %c0_2 = arith.constant 0 : index
    %c0_3 = arith.constant 0 : index
    %c0_4 = arith.constant 0 : index
    %4 = vector.load %arg2[%c0_2, %c0_3, %c0_4] : memref<1x8x128xf32, #tpu.memory_space<vmem>>, vector<1x1x128xf32>
    %5 = vector.shape_cast %4 : vector<1x1x128xf32> to vector<1x128xf32>
    %c0_i32 = arith.constant 0 : i32
    %6 = vector.broadcast %c0_i32 : i32 to vector<8x128xi32>
    %7 = arith.cmpi eq, %2, %6 : vector<8x128xi32>
    %cst_5 = arith.constant -1.000000e+04 : f32
    %8 = vector.broadcast %cst_5 : f32 to vector<8x128xf32>
    %9 = arith.select %7, %8, %3 : vector<8x128xi1>, vector<8x128xf32>
    %c0_i32_6 = arith.constant 0 : i32
    %10 = vector.broadcast %c0_i32_6 : i32 to vector<8x128xi32>
    %11 = arith.cmpi sle, %2, %10 : vector<8x128xi32>
    %12 = vector.broadcast %5 : vector<1x128xf32> to vector<8x128xf32>
    %13 = arith.maximumf %9, %12 : vector<8x128xf32>
    %cst_7 = arith.constant -1.000000e+06 : f32
    %14 = vector.broadcast %cst_7 : f32 to vector<8x128xf32>
    %15 = arith.select %11, %13, %14 : vector<8x128xi1>, vector<8x128xf32>
    %16 = arith.minimumf %1, %15 : vector<8x128xf32>
    %cst_8 = arith.constant dense<0xFF800000> : vector<128xf32>
    %17 = vector.multi_reduction <maximumf>, %16, %cst_8 [0] : vector<8x128xf32> to vector<128xf32>
    %18 = vector.shape_cast %17 : vector<128xf32> to vector<1x128xf32>
    %c0_9 = arith.constant 0 : index
    %c0_10 = arith.constant 0 : index
    %c0_11 = arith.constant 0 : index
    %19 = vector.load %arg4[%c0_9, %c0_10, %c0_11] : memref<1x8x128xf32, #tpu.memory_space<vmem>>, vector<1x1x128xf32>
    %20 = vector.shape_cast %19 : vector<1x1x128xf32> to vector<1x128xf32>
    %21 = vector.shape_cast %18 : vector<1x128xf32> to vector<1x1x128xf32>
    tpu.vector_store %arg4[%c0_9, %c0_10, %c0_11], %21 {strides = array<i32>} : memref<1x8x128xf32, #tpu.memory_space<vmem>>, vector<1x1x128xf32>,
    %c0_12 = arith.constant 0 : index
    %c1 = arith.constant 1 : index
    %c0_13 = arith.constant 0 : index
    %22 = vector.load %arg2[%c0_12, %c1, %c0_13] : memref<1x8x128xf32, #tpu.memory_space<vmem>>, vector<1x1x128xf32>
    %23 = vector.shape_cast %22 : vector<1x1x128xf32> to vector<1x128xf32>
    %c1_i32 = arith.constant 1 : i32
    %24 = vector.broadcast %c1_i32 : i32 to vector<8x128xi32>
    %25 = arith.cmpi eq, %2, %24 : vector<8x128xi32>
    %cst_14 = arith.constant -1.000000e+04 : f32
    %26 = vector.broadcast %cst_14 : f32 to vector<8x128xf32>
    %27 = arith.select %25, %26, %15 : vector<8x128xi1>, vector<8x128xf32>
    %c1_i32_15 = arith.constant 1 : i32
    %28 = vector.broadcast %c1_i32_15 : i32 to vector<8x128xi32>
    %29 = arith.cmpi sle, %2, %28 : vector<8x128xi32>
    %30 = vector.broadcast %23 : vector<1x128xf32> to vector<8x128xf32>
    %31 = arith.maximumf %27, %30 : vector<8x128xf32>
    %cst_16 = arith.constant -1.000000e+06 : f32
    %32 = vector.broadcast %cst_16 : f32 to vector<8x128xf32>
    %33 = arith.select %29, %31, %32 : vector<8x128xi1>, vector<8x128xf32>
    %34 = arith.minimumf %1, %33 : vector<8x128xf32>
    %cst_17 = arith.constant dense<0xFF800000> : vector<128xf32>
    %35 = vector.multi_reduction <maximumf>, %34, %cst_17 [0] : vector<8x128xf32> to vector<128xf32>
    %36 = vector.shape_cast %35 : vector<128xf32> to vector<1x128xf32>
    %c0_18 = arith.constant 0 : index
    %c1_19 = arith.constant 1 : index
    %c0_20 = arith.constant 0 : index
    %37 = vector.load %arg4[%c0_18, %c1_19, %c0_20] : memref<1x8x128xf32, #tpu.memory_space<vmem>>, vector<1x1x128xf32>
    %38 = vector.shape_cast %37 : vector<1x1x128xf32> to vector<1x128xf32>
    %39 = vector.shape_cast %36 : vector<1x128xf32> to vector<1x1x128xf32>
    tpu.vector_store %arg4[%c0_18, %c1_19, %c0_20], %39 {strides = array<i32>} : memref<1x8x128xf32, #tpu.memory_space<vmem>>, vector<1x1x128xf32>,
    %c0_21 = arith.constant 0 : index
    %c2 = arith.constant 2 : index
    %c0_22 = arith.constant 0 : index
    %40 = vector.load %arg2[%c0_21, %c2, %c0_22] : memref<1x8x128xf32, #tpu.memory_space<vmem>>, vector<1x1x128xf32>
    %41 = vector.shape_cast %40 : vector<1x1x128xf32> to vector<1x128xf32>
    %c2_i32 = arith.constant 2 : i32
    %42 = vector.broadcast %c2_i32 : i32 to vector<8x128xi32>
    %43 = arith.cmpi eq, %2, %42 : vector<8x128xi32>
    %cst_23 = arith.constant -1.000000e+04 : f32
    %44 = vector.broadcast %cst_23 : f32 to vector<8x128xf32>
    %45 = arith.select %43, %44, %33 : vector<8x128xi1>, vector<8x128xf32>
    %c2_i32_24 = arith.constant 2 : i32
    %46 = vector.broadcast %c2_i32_24 : i32 to vector<8x128xi32>
    %47 = arith.cmpi sle, %2, %46 : vector<8x128xi32>
    %48 = vector.broadcast %41 : vector<1x128xf32> to vector<8x128xf32>
    %49 = arith.maximumf %45, %48 : vector<8x128xf32>
    %cst_25 = arith.constant -1.000000e+06 : f32
    %50 = vector.broadcast %cst_25 : f32 to vector<8x128xf32>
    %51 = arith.select %47, %49, %50 : vector<8x128xi1>, vector<8x128xf32>
    %52 = arith.minimumf %1, %51 : vector<8x128xf32>
    %cst_26 = arith.constant dense<0xFF800000> : vector<128xf32>
    %53 = vector.multi_reduction <maximumf>, %52, %cst_26 [0] : vector<8x128xf32> to vector<128xf32>
    %54 = vector.shape_cast %53 : vector<128xf32> to vector<1x128xf32>
    %c0_27 = arith.constant 0 : index
    %c2_28 = arith.constant 2 : index
    %c0_29 = arith.constant 0 : index
    %55 = vector.load %arg4[%c0_27, %c2_28, %c0_29] : memref<1x8x128xf32, #tpu.memory_space<vmem>>, vector<1x1x128xf32>
    %56 = vector.shape_cast %55 : vector<1x1x128xf32> to vector<1x128xf32>
    %57 = vector.shape_cast %54 : vector<1x128xf32> to vector<1x1x128xf32>
    tpu.vector_store %arg4[%c0_27, %c2_28, %c0_29], %57 {strides = array<i32>} : memref<1x8x128xf32, #tpu.memory_space<vmem>>, vector<1x1x128xf32>,
    %c0_30 = arith.constant 0 : index
    %c3 = arith.constant 3 : index
    %c0_31 = arith.constant 0 : index
    %58 = vector.load %arg2[%c0_30, %c3, %c0_31] : memref<1x8x128xf32, #tpu.memory_space<vmem>>, vector<1x1x128xf32>
    %59 = vector.shape_cast %58 : vector<1x1x128xf32> to vector<1x128xf32>
    %c3_i32 = arith.constant 3 : i32
    %60 = vector.broadcast %c3_i32 : i32 to vector<8x128xi32>
    %61 = arith.cmpi eq, %2, %60 : vector<8x128xi32>
    %cst_32 = arith.constant -1.000000e+04 : f32
    %62 = vector.broadcast %cst_32 : f32 to vector<8x128xf32>
    %63 = arith.select %61, %62, %51 : vector<8x128xi1>, vector<8x128xf32>
    %c3_i32_33 = arith.constant 3 : i32
    %64 = vector.broadcast %c3_i32_33 : i32 to vector<8x128xi32>
    %65 = arith.cmpi sle, %2, %64 : vector<8x128xi32>
    %66 = vector.broadcast %59 : vector<1x128xf32> to vector<8x128xf32>
    %67 = arith.maximumf %63, %66 : vector<8x128xf32>
    %cst_34 = arith.constant -1.000000e+06 : f32
    %68 = vector.broadcast %cst_34 : f32 to vector<8x128xf32>
    %69 = arith.select %65, %67, %68 : vector<8x128xi1>, vector<8x128xf32>
    %70 = arith.minimumf %1, %69 : vector<8x128xf32>
    %cst_35 = arith.constant dense<0xFF800000> : vector<128xf32>
    %71 = vector.multi_reduction <maximumf>, %70, %cst_35 [0] : vector<8x128xf32> to vector<128xf32>
    %72 = vector.shape_cast %71 : vector<128xf32> to vector<1x128xf32>
    %c0_36 = arith.constant 0 : index
    %c3_37 = arith.constant 3 : index
    %c0_38 = arith.constant 0 : index
    %73 = vector.load %arg4[%c0_36, %c3_37, %c0_38] : memref<1x8x128xf32, #tpu.memory_space<vmem>>, vector<1x1x128xf32>
    %74 = vector.shape_cast %73 : vector<1x1x128xf32> to vector<1x128xf32>
    %75 = vector.shape_cast %72 : vector<1x128xf32> to vector<1x1x128xf32>
    tpu.vector_store %arg4[%c0_36, %c3_37, %c0_38], %75 {strides = array<i32>} : memref<1x8x128xf32, #tpu.memory_space<vmem>>, vector<1x1x128xf32>,
    %c0_39 = arith.constant 0 : index
    %c4 = arith.constant 4 : index
    %c0_40 = arith.constant 0 : index
    %76 = vector.load %arg2[%c0_39, %c4, %c0_40] : memref<1x8x128xf32, #tpu.memory_space<vmem>>, vector<1x1x128xf32>
    %77 = vector.shape_cast %76 : vector<1x1x128xf32> to vector<1x128xf32>
    %c4_i32 = arith.constant 4 : i32
    %78 = vector.broadcast %c4_i32 : i32 to vector<8x128xi32>
    %79 = arith.cmpi eq, %2, %78 : vector<8x128xi32>
    %cst_41 = arith.constant -1.000000e+04 : f32
    %80 = vector.broadcast %cst_41 : f32 to vector<8x128xf32>
    %81 = arith.select %79, %80, %69 : vector<8x128xi1>, vector<8x128xf32>
    %c4_i32_42 = arith.constant 4 : i32
    %82 = vector.broadcast %c4_i32_42 : i32 to vector<8x128xi32>
    %83 = arith.cmpi sle, %2, %82 : vector<8x128xi32>
    %84 = vector.broadcast %77 : vector<1x128xf32> to vector<8x128xf32>
    %85 = arith.maximumf %81, %84 : vector<8x128xf32>
    %cst_43 = arith.constant -1.000000e+06 : f32
    %86 = vector.broadcast %cst_43 : f32 to vector<8x128xf32>
    %87 = arith.select %83, %85, %86 : vector<8x128xi1>, vector<8x128xf32>
    %88 = arith.minimumf %1, %87 : vector<8x128xf32>
    %cst_44 = arith.constant dense<0xFF800000> : vector<128xf32>
    %89 = vector.multi_reduction <maximumf>, %88, %cst_44 [0] : vector<8x128xf32> to vector<128xf32>
    %90 = vector.shape_cast %89 : vector<128xf32> to vector<1x128xf32>
    %c0_45 = arith.constant 0 : index
    %c4_46 = arith.constant 4 : index
    %c0_47 = arith.constant 0 : index
    %91 = vector.load %arg4[%c0_45, %c4_46, %c0_47] : memref<1x8x128xf32, #tpu.memory_space<vmem>>, vector<1x1x128xf32>
    %92 = vector.shape_cast %91 : vector<1x1x128xf32> to vector<1x128xf32>
    %93 = vector.shape_cast %90 : vector<1x128xf32> to vector<1x1x128xf32>
    tpu.vector_store %arg4[%c0_45, %c4_46, %c0_47], %93 {strides = array<i32>} : memref<1x8x128xf32, #tpu.memory_space<vmem>>, vector<1x1x128xf32>,
    %c0_48 = arith.constant 0 : index
    %c5 = arith.constant 5 : index
    %c0_49 = arith.constant 0 : index
    %94 = vector.load %arg2[%c0_48, %c5, %c0_49] : memref<1x8x128xf32, #tpu.memory_space<vmem>>, vector<1x1x128xf32>
    %95 = vector.shape_cast %94 : vector<1x1x128xf32> to vector<1x128xf32>
    %c5_i32 = arith.constant 5 : i32
    %96 = vector.broadcast %c5_i32 : i32 to vector<8x128xi32>
    %97 = arith.cmpi eq, %2, %96 : vector<8x128xi32>
    %cst_50 = arith.constant -1.000000e+04 : f32
    %98 = vector.broadcast %cst_50 : f32 to vector<8x128xf32>
    %99 = arith.select %97, %98, %87 : vector<8x128xi1>, vector<8x128xf32>
    %c5_i32_51 = arith.constant 5 : i32
    %100 = vector.broadcast %c5_i32_51 : i32 to vector<8x128xi32>
    %101 = arith.cmpi sle, %2, %100 : vector<8x128xi32>
    %102 = vector.broadcast %95 : vector<1x128xf32> to vector<8x128xf32>
    %103 = arith.maximumf %99, %102 : vector<8x128xf32>
    %cst_52 = arith.constant -1.000000e+06 : f32
    %104 = vector.broadcast %cst_52 : f32 to vector<8x128xf32>
    %105 = arith.select %101, %103, %104 : vector<8x128xi1>, vector<8x128xf32>
    %106 = arith.minimumf %1, %105 : vector<8x128xf32>
    %cst_53 = arith.constant dense<0xFF800000> : vector<128xf32>
    %107 = vector.multi_reduction <maximumf>, %106, %cst_53 [0] : vector<8x128xf32> to vector<128xf32>
    %108 = vector.shape_cast %107 : vector<128xf32> to vector<1x128xf32>
    %c0_54 = arith.constant 0 : index
    %c5_55 = arith.constant 5 : index
    %c0_56 = arith.constant 0 : index
    %109 = vector.load %arg4[%c0_54, %c5_55, %c0_56] : memref<1x8x128xf32, #tpu.memory_space<vmem>>, vector<1x1x128xf32>
    %110 = vector.shape_cast %109 : vector<1x1x128xf32> to vector<1x128xf32>
    %111 = vector.shape_cast %108 : vector<1x128xf32> to vector<1x1x128xf32>
    tpu.vector_store %arg4[%c0_54, %c5_55, %c0_56], %111 {strides = array<i32>} : memref<1x8x128xf32, #tpu.memory_space<vmem>>, vector<1x1x128xf32>,
    %c0_57 = arith.constant 0 : index
    %c6 = arith.constant 6 : index
    %c0_58 = arith.constant 0 : index
    %112 = vector.load %arg2[%c0_57, %c6, %c0_58] : memref<1x8x128xf32, #tpu.memory_space<vmem>>, vector<1x1x128xf32>
    %113 = vector.shape_cast %112 : vector<1x1x128xf32> to vector<1x128xf32>
    %c6_i32 = arith.constant 6 : i32
    %114 = vector.broadcast %c6_i32 : i32 to vector<8x128xi32>
    %115 = arith.cmpi eq, %2, %114 : vector<8x128xi32>
    %cst_59 = arith.constant -1.000000e+04 : f32
    %116 = vector.broadcast %cst_59 : f32 to vector<8x128xf32>
    %117 = arith.select %115, %116, %105 : vector<8x128xi1>, vector<8x128xf32>
    %c6_i32_60 = arith.constant 6 : i32
    %118 = vector.broadcast %c6_i32_60 : i32 to vector<8x128xi32>
    %119 = arith.cmpi sle, %2, %118 : vector<8x128xi32>
    %120 = vector.broadcast %113 : vector<1x128xf32> to vector<8x128xf32>
    %121 = arith.maximumf %117, %120 : vector<8x128xf32>
    %cst_61 = arith.constant -1.000000e+06 : f32
    %122 = vector.broadcast %cst_61 : f32 to vector<8x128xf32>
    %123 = arith.select %119, %121, %122 : vector<8x128xi1>, vector<8x128xf32>
    %124 = arith.minimumf %1, %123 : vector<8x128xf32>
    %cst_62 = arith.constant dense<0xFF800000> : vector<128xf32>
    %125 = vector.multi_reduction <maximumf>, %124, %cst_62 [0] : vector<8x128xf32> to vector<128xf32>
    %126 = vector.shape_cast %125 : vector<128xf32> to vector<1x128xf32>
    %c0_63 = arith.constant 0 : index
    %c6_64 = arith.constant 6 : index
    %c0_65 = arith.constant 0 : index
    %127 = vector.load %arg4[%c0_63, %c6_64, %c0_65] : memref<1x8x128xf32, #tpu.memory_space<vmem>>, vector<1x1x128xf32>
    %128 = vector.shape_cast %127 : vector<1x1x128xf32> to vector<1x128xf32>
    %129 = vector.shape_cast %126 : vector<1x128xf32> to vector<1x1x128xf32>
    tpu.vector_store %arg4[%c0_63, %c6_64, %c0_65], %129 {strides = array<i32>} : memref<1x8x128xf32, #tpu.memory_space<vmem>>, vector<1x1x128xf32>,
    %c0_66 = arith.constant 0 : index
    %c7 = arith.constant 7 : index
    %c0_67 = arith.constant 0 : index
    %130 = vector.load %arg2[%c0_66, %c7, %c0_67] : memref<1x8x128xf32, #tpu.memory_space<vmem>>, vector<1x1x128xf32>
    %131 = vector.shape_cast %130 : vector<1x1x128xf32> to vector<1x128xf32>
    %c7_i32 = arith.constant 7 : i32
    %132 = vector.broadcast %c7_i32 : i32 to vector<8x128xi32>
    %133 = arith.cmpi eq, %2, %132 : vector<8x128xi32>
    %cst_68 = arith.constant -1.000000e+04 : f32
    %134 = vector.broadcast %cst_68 : f32 to vector<8x128xf32>
    %135 = arith.select %133, %134, %123 : vector<8x128xi1>, vector<8x128xf32>
    %c7_i32_69 = arith.constant 7 : i32
    %136 = vector.broadcast %c7_i32_69 : i32 to vector<8x128xi32>
    %137 = arith.cmpi sle, %2, %136 : vector<8x128xi32>
    %138 = vector.broadcast %131 : vector<1x128xf32> to vector<8x128xf32>
    %139 = arith.maximumf %135, %138 : vector<8x128xf32>
    %cst_70 = arith.constant -1.000000e+06 : f32
    %140 = vector.broadcast %cst_70 : f32 to vector<8x128xf32>
    %141 = arith.select %137, %139, %140 : vector<8x128xi1>, vector<8x128xf32>
    %142 = arith.minimumf %1, %141 : vector<8x128xf32>
    %cst_71 = arith.constant dense<0xFF800000> : vector<128xf32>
    %143 = vector.multi_reduction <maximumf>, %142, %cst_71 [0] : vector<8x128xf32> to vector<128xf32>
    %144 = vector.shape_cast %143 : vector<128xf32> to vector<1x128xf32>
    %c0_72 = arith.constant 0 : index
    %c7_73 = arith.constant 7 : index
    %c0_74 = arith.constant 0 : index
    %145 = vector.load %arg4[%c0_72, %c7_73, %c0_74] : memref<1x8x128xf32, #tpu.memory_space<vmem>>, vector<1x1x128xf32>
    %146 = vector.shape_cast %145 : vector<1x1x128xf32> to vector<1x128xf32>
    %147 = vector.shape_cast %144 : vector<1x128xf32> to vector<1x1x128xf32>
    tpu.vector_store %arg4[%c0_72, %c7_73, %c0_74], %147 {strides = array<i32>} : memref<1x8x128xf32, #tpu.memory_space<vmem>>, vector<1x1x128xf32>,
    return
  }
  func.func @transform_0(%arg0: i32, %arg1: i32) -> (i32, i32, i32) {
    %c0_i32 = arith.constant 0 : i32
    %c0_i32_0 = arith.constant 0 : i32
    return %arg0, %c0_i32, %arg1 : i32, i32, i32
  }
  func.func @transform_1(%arg0: i32, %arg1: i32) -> (i32, i32, i32) {
    %c0_i32 = arith.constant 0 : i32
    %c0_i32_0 = arith.constant 0 : i32
    return %arg0, %c0_i32, %arg1 : i32, i32, i32
  }
  func.func @transform_2(%arg0: i32, %arg1: i32) -> (i32, i32, i32) {
    %c0_i32 = arith.constant 0 : i32
    %c0_i32_0 = arith.constant 0 : i32
    return %arg0, %c0_i32, %arg1 : i32, i32, i32
  }
}

</mosaic_0001>

<bundles_post_ra>
// kernel: tpu_custom_call.1
= control target key start
LH: loop header
LB: loop body
LE: loop exit
PB: predicated region body
PF: predicated region fallthrough
CT: control target
= control target key end

     0   :  { %7 = vsyncpa [#allocation3], 0  ;;  %s949_s0 = inlined_call_operand.hbm [shape: f32[2,8,128], index: 0, kind: input, shape index: {}]   ;;  %s950_s1 = inlined_call_operand.hbm [shape: f32[2,8,128], index: 1, kind: input, shape index: {}]   ;;  %s951_s2 = inlined_call_operand.hbm [shape: f32[2,8,128], index: 2, kind: output, shape index: {}]  }
   0x1   :  { %9 = vsyncpa [#allocation3 + $0x1], 0 }
   0x2   :  { %10 = vsyncpa [#allocation6], 0 }
   0x3   :  { %12 = vsyncpa [#allocation6 + $0x1], 0 }
   0x4   :  { %13 = vsyncpa [#allocation4], 0 }
   0x5   :  { %15 = vsyncpa [#allocation4 + $0x1], 0  ;;  %s735_s9 = smov 0   ;;  %s737_s10 = smov 0  }
   0x6   :  { %s739_s11 = smov 0   ;;  %s741_s12 = smov 0  }
   0x7   :  { %s743_s13 = smov 0   ;;  %s745_s14 = smov 0  }
   0x8 LB: > { %s482_s15 = sadd.s32 4294967295, %s714_s14   ;;  %s483_s16 = sadd.s32 4294967294, %s714_s14   ;;  %s714_s14 = sphi %s745_s14, %s21_s14   ;;  %s710_s13 = sphi %s743_s13, %s963_s13   ;;  %s706_s12 = sphi %s741_s12, %s962_s12   ;;  %s702_s11 = sphi %s739_s11, %s961_s11   ;;  %s698_s10 = sphi %s737_s10, %s960_s10   ;;  %s694_s9 = sphi %s735_s9, %s959_s9  }
   0x9   : > { %s33_s17 = sadd.s32 1, %s710_s13  ;;  %s42_s18 = sadd.s32 1, %s702_s11 }
   0xa   : > { %p35_p0 = scmp.ge.s32.totalorder %s33_s17, 2  ;;  %p49_p1 = scmp.ne.s32.totalorder %s702_s11, %s698_s10 }
   0xb   : > { %p50_p2 = scmp.eq.s32.totalorder %s714_s14, 0  ;;  %p55_p3 = scmp.ne.s32.totalorder %s698_s10, %s694_s9 }
   0xc   : > { %s965_s17 = smov (%p35_p0, %s33_s17), 0  ;;  %p56_p5 = scmp.eq.s32.totalorder %s482_s15, 0 }
   0xd   : > { %p776_p4 = por %p50_p2, %p49_p1  ;;  %s37_s20 = ssub.s32 %s710_s13, %s965_s17 }
   0xe   : > { %p109_p6 = scmp.eq.s32.totalorder %s482_s15, 1  ;;  %p40_p7 = scmp.eq.s32.totalorder %s37_s20, 0 }
   0xf   : > { %p782_p8 = por %p56_p5, %p55_p3  ;;  %p115_p10 = scmp.eq.s32.totalorder %s483_s16, 1 }
  0x10   : > { %p786_p9 = por %p109_p6, %p49_p1  ;;  %p523_p13 = scmp.lt.s32.totalorder %s714_s14, 2 }
  0x11   : > { %s791_s23 = scalar_select %p40_p7, %s702_s11, %s42_s18  }
  0x12   : > { %p793_p11 = por %p115_p10, %p55_p3  ;;  %s800_s25 = sand.u32 1, %s702_s11  }
  0x13   : > { %s486_s26 = sshll.u32 %s800_s25, 3  ;;  %s487_s27 = sshll.u32 %s710_s13, 7 }
  0x14   : > { %s145_s30 = scalar_lea.hbm %s949_s0, %s487_s27  ;;  %s139_s3 = scalar_lea.vmem [#allocation2], %s486_s26 }
  0x15   : > { %s147_s4 = sshll.u32 %s139_s3, 4  ;;  %p809_p0 = pnand %p523_p13, %p776_p4  ;;  %s148_s4 = int_to_ptr.vmem [resolvable:$true] %s147_s4 }
  0x16   : > { %p490_p1 = scmp.ge.s32.totalorder %s714_s14, 1  ;;  %p171_p2 = scmp.lt.s32.totalorder %s714_s14, 3 }
  0x17   : > { %s136_s6 = scalar_lea.sflag [#allocation3], %s800_s25  ;;  %p576_p3 = pneg %p809_p0 }
  0x18   : > { %s587_s7 = scalar_lea.vmem %s148_s4, 128  ;;  %s716_s8 = smov [#allocation2]  }
  0x19   : > { %p588_p5 = scmp.ne.s32.totalorder %s148_s4, %s587_s7  ;;  %s592_s15 = sshll.u32 %s716_s8, 4  ;;  %s593_s15 = int_to_ptr.vmem [resolvable:$false] %s592_s15 }
  0x1a   : > { %s594_s16 = scalar_lea.vmem %s593_s15, 256  ;;  %p595_p4 = scmp.lt.s32.totalorder %s148_s4, %s593_s15 }
  0x1b   : > { %p590_p6 = pnand %p588_p5, %p576_p3  ;;  %p596_p10 = scmp.lt.s32.totalorder %s594_s16, %s587_s7 }
  0x1d   : > { %p591_p7 = pneg %p590_p6  ;;  %p597_p13 = por %p596_p10, %p595_p4 }
  0x1f   : > { %p598_p12 = pnand %p597_p13, %p591_p7 }
  0x21   : > { %601 = shalt.err (!%p598_p12)
}
  0x22   : > { %515 = dma.hbm_to_vmem [thread:$0]  (!%p809_p0), %s145_s30, 128, %s148_s4, %s136_s6  }
  0x23   : > { %p827_p5 = pnand %p490_p1, %p171_p2  ;;  %s164_s28 = scalar_lea.hbm %s950_s1, %s487_s27 }
  0x24   : > { %s158_s29 = scalar_lea.vmem [#allocation5], %s486_s26  ;;  %s155_s7 = scalar_lea.sflag [#allocation6], %s800_s25 }
  0x25   : > { %s166_s3 = sshll.u32 %s158_s29, 4  ;;  %s717_s30 = smov [#allocation5]   ;;  %s167_s3 = int_to_ptr.vmem [resolvable:$true] %s166_s3 }
  0x26   : > { %s615_s8 = scalar_lea.vmem %s167_s3, 128  ;;  %s620_s4 = sshll.u32 %s717_s30, 4  ;;  %s621_s4 = int_to_ptr.vmem [resolvable:$false] %s620_s4 }
  0x27   : > { %p616_p12 = scmp.ne.s32.totalorder %s167_s3, %s615_s8  ;;  %s622_s6 = scalar_lea.vmem %s621_s4, 256 }
  0x28   : > { %p623_p1 = scmp.lt.s32.totalorder %s167_s3, %s621_s4  ;;  %p624_p2 = scmp.lt.s32.totalorder %s622_s6, %s615_s8 }
  0x29   : > { %p618_p6 = pnand %p616_p12, %p576_p3 }
  0x2a   : > { %p625_p4 = por %p624_p2, %p623_p1 }
  0x2b   : > { %p619_p7 = pneg %p618_p6 }
  0x2d   : > { %p626_p10 = pnand %p625_p4, %p619_p7 }
  0x2f   : > { %629 = shalt.err (!%p626_p10)
}
  0x30   : > { %518 = dma.hbm_to_vmem [thread:$0]  (!%p809_p0), %s164_s28, 128, %s167_s3, %s155_s7  }
  0x31   : > { %175 = sbr.rel (%p827_p5) target bundleno = 121 (0x79), region = 28  ;;  %s843_s25 = sand.u32 (!%p827_p5), 1, %s698_s10  }
  0x32   : > { %s846_s26 = sshll.u32 (!%p827_p5), %s843_s25, 3  ;;  %s178_s27 = scalar_lea.sflag (!%p827_p5), [#allocation3], %s843_s25 }
  0x33   : > { %s850_s15 = scalar_lea.vmem (!%p827_p5), [#allocation2], %s846_s26 }
  0x36   : > { %681 = dma.done.wait (%p782_p8), %s178_s27, 128  }
  0x37   : > { %683 = vsyncadd (%p782_p8), %s178_s27, 4294967168  ;;  %s187_s5 = scalar_lea.sflag [#allocation6], %s843_s25  ;;  %s190_s16 = scalar_lea.vmem [#allocation5], %s846_s26 }
  0x38   : > { %685 = dma.done.wait (%p782_p8), %s187_s5, 128  }
  0x39   : > { %687 = vsyncadd (%p782_p8), %s187_s5, 4294967168  ;;  %v217_v0 = vlaneseq  ;;  %v718_v2 = vmov -1000000.0   ;;  %v494_v4 = vld [vmem:[%s850_s15] ss:$0 sm:$0xff]  ;;  %v867_v5 = vld [vmem:[%s190_s16] sm:$0xff] }
  0x3a   : > { %v495_v7 = vld [vmem:[%s850_s15 + $0x1] ss:$0 sm:$0xff]  ;;  %v496_v13 = vld [vmem:[%s850_s15 + $0x2] ss:$0 sm:$0xff]  ;;  %v497_v21 = vld [vmem:[%s850_s15 + $0x3] ss:$0 sm:$0xff] }
  0x3b   : > { %v862_v1 = vshrl.u32 %v217_v0, 7  ;;  %v498_v32 = vld [vmem:[%s850_s15 + $0x4] ss:$0 sm:$0xff]  ;;  %s887_s21 = scalar_lea.vmem [#allocation7], %s846_s26  ;;  %v499_v42 = vld [vmem:[%s850_s15 + $0x5] ss:$0 sm:$0xff] }
  0x3c   : > { %v500_v53 = vld [vmem:[%s850_s15 + $0x6] ss:$0 sm:$0xff]  ;;  %v501_v0 = vld [vmem:[%s850_s15 + $0x7] ss:$0 sm:$0xff]  ;;  %s503_s18 = sshll.u32 %s706_s12, 7  ;;  %s378_s19 = sshll.u32 %s887_s21, 4  ;;  %s379_s19 = int_to_ptr.vmem [resolvable:$true] %s378_s19 }
  0x3d   : > { %vm220_vm0 = vcmp.eq.s32.totalorder %v862_v1, 0  ;;  %vm222_vm1 = vcmp.le.s32.totalorder %v862_v1, 0  ;;  %vm238_vm2 = vcmp.eq.s32.totalorder %v862_v1, 1  ;;  %vm240_vm3 = vcmp.le.s32.totalorder %v862_v1, 1  ;;  %s376_s29 = scalar_lea.hbm %s951_s2, %s503_s18  ;;  %s364_s3 = scalar_lea.sflag [#allocation4], %s843_s25 }
  0x3e   : > { %v221_v3 = vsel %vm220_vm0, -10000.0, %v718_v2  ;;  %vm256_vm4 = vcmp.eq.s32.totalorder %v862_v1, 2  ;;  %vm258_vm5 = vcmp.le.s32.totalorder %v862_v1, 2  ;;  %vm274_vm6 = vcmp.eq.s32.totalorder %v862_v1, 3  ;;  %s630_s7 = scalar_lea.vmem %s379_s19, 128  ;;  %s719_s8 = smov [#allocation7]  }
  0x3f   : > { %v227_v6 = vmax.f32 %v221_v3, %v494_v4  ;;  %vm276_vm7 = vcmp.le.s32.totalorder %v862_v1, 3  ;;  %vm292_vm8 = vcmp.eq.s32.totalorder %v862_v1, 4  ;;  %vm294_vm9 = vcmp.le.s32.totalorder %v862_v1, 4  ;;  %p631_p8 = scmp.ne.s32.totalorder %s379_s19, %s630_s7  ;;  %s634_s30 = sshll.u32 %s719_s8, 4  ;;  %s635_s30 = int_to_ptr.vmem [resolvable:$false] %s634_s30 }
  0x40   : > { %vm310_vm10 = vcmp.eq.s32.totalorder %v862_v1, 5  ;;  %vm312_vm11 = vcmp.le.s32.totalorder %v862_v1, 5  ;;  %vm328_vm12 = vcmp.eq.s32.totalorder %v862_v1, 6  ;;  %vm330_vm13 = vcmp.le.s32.totalorder %v862_v1, 6  ;;  %s636_s12 = scalar_lea.vmem %s635_s30, 256  ;;  %p637_p13 = scmp.lt.s32.totalorder %s379_s19, %s635_s30 }
  0x41   : > { %v228_v8 = vsel %vm222_vm1, %v227_v6, -1000000.0  ;;  %vm346_vm14 = vcmp.eq.s32.totalorder %v862_v1, 7  ;;  %p632_p0 = pnand %p631_p8, %p786_p9  ;;  %p638_p5 = scmp.lt.s32.totalorder %s636_s12, %s630_s7 }
  0x42   : > { %v229_v9 = vmin.f32 %v867_v5, %v228_v8  ;;  %v239_v10 = vsel %vm238_vm2, -10000.0, %v228_v8 }
  0x43   : > { %v245_v11 = vmax.f32 %v239_v10, %v495_v7  ;;  %p633_p3 = pneg %p632_p0  ;;  %p639_p12 = por %p638_p5, %p637_p13 }
  0x44   : > { %v230_v12 = vrot.slane %v229_v9, 4 }
  0x45   : > { %v246_v14 = vsel %vm240_vm3, %v245_v11, -1000000.0  ;;  %p640_p6 = pnand %p639_p12, %p633_p3 }
  0x46   : > { %v231_v15 = vmax.f32 %v229_v9, %v230_v12  ;;  %v247_v16 = vmin.f32 %v867_v5, %v246_v14  ;;  %v257_v17 = vsel %vm256_vm4, -10000.0, %v246_v14 }
  0x47   : > { %v263_v18 = vmax.f32 %v257_v17, %v496_v13 }
  0x48   : > { %v232_v19 = vrot.slane %v231_v15, 2  ;;  %v248_v20 = vrot.slane %v247_v16, 4 }
  0x49   : > { %v264_v22 = vsel %vm258_vm5, %v263_v18, -1000000.0 }
  0x4a   : > { %v233_v23 = vmax.f32 %v231_v15, %v232_v19  ;;  %v249_v24 = vmax.f32 %v247_v16, %v248_v20  ;;  %v265_v25 = vmin.f32 %v867_v5, %v264_v22  ;;  %v275_v26 = vsel %vm274_vm6, -10000.0, %v264_v22 }
  0x4b   : > { %v281_v27 = vmax.f32 %v275_v26, %v497_v21 }
  0x4c   : > { %v234_v28 = vrot.slane %v233_v23, 1  ;;  %v250_v29 = vrot.slane %v249_v24, 2  ;;  %v266_v30 = vrot.slane %v265_v25, 4 }
  0x4d   : > { %v282_v31 = vsel %vm276_vm7, %v281_v27, -1000000.0 }
  0x4e   : > { %v235_v33 = vmax.f32 %v233_v23, %v234_v28  ;;  %v251_v34 = vmax.f32 %v249_v24, %v250_v29  ;;  %v267_v35 = vmax.f32 %v265_v25, %v266_v30  ;;  %v283_v36 = vmin.f32 %v867_v5, %v282_v31 }
  0x4f   : > { %v293_v37 = vsel %vm292_vm8, -10000.0, %v282_v31 }
  0x50   : > { %236 = vst [vmem:[%s887_s21] sm:$0x1] %v235_v33  ;;  %v252_v38 = vrot.slane %v251_v34, 1  ;;  %v268_v39 = vrot.slane %v267_v35, 2  ;;  %v284_v40 = vrot.slane %v283_v36, 4  ;;  %v299_v41 = vmax.f32 %v293_v37, %v498_v32 }
  0x52   : > { %v253_v43 = vmax.f32 %v251_v34, %v252_v38  ;;  %v269_v44 = vmax.f32 %v267_v35, %v268_v39  ;;  %v285_v45 = vmax.f32 %v283_v36, %v284_v40  ;;  %v300_v46 = vsel %vm294_vm9, %v299_v41, -1000000.0 }
  0x53   : > { %v301_v47 = vmin.f32 %v867_v5, %v300_v46  ;;  %v311_v48 = vsel %vm310_vm10, -10000.0, %v300_v46 }
  0x54   : > { %254 = vst [vmem:[%s887_s21 + $0x1] sm:$0x1] %v253_v43  ;;  %v270_v49 = vrot.slane %v269_v44, 1  ;;  %v286_v50 = vrot.slane %v285_v45, 2  ;;  %v317_v51 = vmax.f32 %v311_v48, %v499_v42 }
  0x55   : > { %v302_v52 = vrot.slane %v301_v47, 4 }
  0x56   : > { %v271_v54 = vmax.f32 %v269_v44, %v270_v49  ;;  %v287_v55 = vmax.f32 %v285_v45, %v286_v50  ;;  %v318_v56 = vsel %vm312_vm11, %v317_v51, -1000000.0 }
  0x57   : > { %v303_v57 = vmax.f32 %v301_v47, %v302_v52  ;;  %v319_v58 = vmin.f32 %v867_v5, %v318_v56  ;;  %v329_v59 = vsel %vm328_vm12, -10000.0, %v318_v56 }
  0x58   : > { %272 = vst [vmem:[%s887_s21 + $0x2] sm:$0x1] %v271_v54  ;;  %v288_v60 = vrot.slane %v287_v55, 1  ;;  %v335_v61 = vmax.f32 %v329_v59, %v500_v53 }
  0x59   : > { %v304_v62 = vrot.slane %v303_v57, 2  ;;  %v320_v63 = vrot.slane %v319_v58, 4 }
  0x5a   : > { %v289_v2 = vmax.f32 %v287_v55, %v288_v60  ;;  %v336_v3 = vsel %vm330_vm13, %v335_v61, -1000000.0 }
  0x5b   : > { %v305_v4 = vmax.f32 %v303_v57, %v304_v62  ;;  %v321_v6 = vmax.f32 %v319_v58, %v320_v63  ;;  %v337_v7 = vmin.f32 %v867_v5, %v336_v3  ;;  %v347_v8 = vsel %vm346_vm14, -10000.0, %v336_v3 }
  0x5c   : > { %290 = vst [vmem:[%s887_s21 + $0x3] sm:$0x1] %v289_v2  ;;  %v353_v9 = vmax.f32 %v347_v8, %v501_v0 }
  0x5d   : > { %v306_v10 = vrot.slane %v305_v4, 1  ;;  %v322_v11 = vrot.slane %v321_v6, 2  ;;  %v338_v12 = vrot.slane %v337_v7, 4 }
  0x5e   : > { %v355_v13 = vmin.f32 %v867_v5, %v353_v9 }
  0x5f   : > { %v307_v1 = vmax.f32 %v305_v4, %v306_v10  ;;  %v323_v14 = vmax.f32 %v321_v6, %v322_v11  ;;  %v339_v15 = vmax.f32 %v337_v7, %v338_v12 }
  0x60   : > { %v356_v16 = vrot.slane %v355_v13, 4 }
  0x61   : > { %308 = vst [vmem:[%s887_s21 + $0x4] sm:$0x1] %v307_v1  ;;  %v324_v17 = vrot.slane %v323_v14, 1  ;;  %v340_v18 = vrot.slane %v339_v15, 2 }
  0x62   : > { %v357_v19 = vmax.f32 %v355_v13, %v356_v16 }
  0x63   : > { %v325_v20 = vmax.f32 %v323_v14, %v324_v17  ;;  %v341_v21 = vmax.f32 %v339_v15, %v340_v18 }
  0x64   : > { %v358_v22 = vrot.slane %v357_v19, 2 }
  0x65   : > { %326 = vst [vmem:[%s887_s21 + $0x5] sm:$0x1] %v325_v20  ;;  %v342_v23 = vrot.slane %v341_v21, 1 }
  0x66   : > { %v359_v5 = vmax.f32 %v357_v19, %v358_v22 }
  0x67   : > { %v343_v24 = vmax.f32 %v341_v21, %v342_v23 }
  0x68   : > { %v360_v25 = vrot.slane %v359_v5, 1 }
  0x69   : > { %344 = vst [vmem:[%s887_s21 + $0x6] sm:$0x1] %v343_v24 }
  0x6a   : > { %v361_v26 = vmax.f32 %v359_v5, %v360_v25 }
  0x6c   : > { %362 = vst [vmem:[%s887_s21 + $0x7] sm:$0x1] %v361_v26 }
  0x6d   : > { %643 = shalt.err (!%p640_p6)
}
  0x6e   : > { %s644_s4 = scalar_lea.hbm %s376_s29, 128  ;;  %s648_s26 = scalar_lea.hbm %s951_s2, 256 }
  0x6f   : > { %p645_p7 = scmp.ne.s32.totalorder %s376_s29, %s644_s4  ;;  %p649_p4 = scmp.lt.s32.totalorder %s376_s29, %s951_s2 }
  0x70   : > { %p650_p10 = scmp.lt.s32.totalorder %s648_s26, %s644_s4 }
  0x71   : > { %p646_p1 = pnand %p645_p7, %p786_p9 }
  0x72   : > { %p651_p8 = por %p650_p10, %p649_p4 }
  0x73   : > { %p647_p2 = pneg %p646_p1 }
  0x75   : > { %p652_p0 = pnand %p651_p8, %p647_p2 }
  0x77   : > { %655 = shalt.err (!%p652_p0)
}
  0x78   : > { %510 = dma.vmem_to_hbm [thread:$0]  (%p786_p9), %s379_s19, 128, %s376_s29, %s364_s3  }
  0x79 PF: > { %s390_s5 = sand.u32 1, %s694_s9   ;;  %p958_p3 = scmp.ge.s32.totalorder %s714_s14, 2 }
  0x7a   : > { %s391_s16 = scalar_lea.sflag [#allocation4], %s390_s5 }
  0x7b   : > { %p520_p13 = pnand %p958_p3, %p793_p11 }
  0x7d   : > { %p521_p5 = pneg %p520_p13 }
  0x7f   : > { %689 = dma.done.wait (%p521_p5), %s391_s16, 128  }
  0x80   : > { %691 = vsyncadd (%p521_p5), %s391_s16, 4294967168  ;;  %s21_s14 = sadd.s32 1, %s714_s14   ;;  %s959_s9 = smov %s698_s10 }
  0x81   : > { %p18_p12 = scmp.ge.s32.totalorder %s21_s14, 4   ;;  %s960_s10 = smov %s702_s11 }
  0x82   : > { %s961_s11 = smov %s791_s23  ;;  %s962_s12 = smov %s710_s13 }
  0x83   : > { %s963_s13 = smov %s965_s17  ;;  %20 = sbr.rel (!%p18_p12) target bundleno = 8 (0x8), region = 86 }
  0x88   :  { %396 = vsyncpa [#allocation3], 1 }
  0x89   :  { %398 = vsyncpa [#allocation3 + $0x1], 1 }
  0x8a   :  { %399 = vsyncpa [#allocation6], 1 }
  0x8b   :  { %401 = vsyncpa [#allocation6 + $0x1], 1 }
  0x8c   :  { %402 = vsyncpa [#allocation4], 1 }
  0x8d   :  { %404 = vsyncpa [#allocation4 + $0x1], 1 }

</bundles_post_ra>
